<compile_context>
chip_gen: v7x
topology: tpu7x:2x2x1
jax: 0.10.0
libtpu: 0.0.40
codegen_flags: <defaults>
</compile_context>

<pallas_src>
import functools

import jax
import jax.numpy as jnp
from jax.experimental import pallas as pl
from jax.experimental.pallas import tpu as pltpu

EPS = 1e-8
_LANE = 128
_MIN_CHUNK = 512      # lanes per in-kernel chunk (multiple of 128)
_MAX_CHUNKS = 8       # chunks are statically unrolled; bound the unroll


def _sublane_multiple(dtype):
    """Row-tile granularity: 8 for f32, 16 for bf16, 32 for int8."""
    itemsize = jnp.dtype(dtype).itemsize
    return max(8, 32 // max(itemsize, 1))


def _vmem_capacity_bytes():
    """Physical VMEM per TensorCore, with conservative fallbacks."""
    try:
        cap = int(pltpu.get_tpu_info().vmem_capacity_bytes)
        if cap >= (32 << 20):
            return cap
    except Exception:
        pass
    try:
        kind = jax.devices()[0].device_kind.lower()
        if "v5" in kind or "v6" in kind:
            return 128 << 20
    except Exception:
        pass
    return 64 << 20      # v7x-safe default


def _pick_chunk(s_len):
    """Lane-chunk width: >=512, multiple of 128, at most _MAX_CHUNKS chunks."""
    if s_len <= _MIN_CHUNK:
        return s_len
    chunk = -(-s_len // _MAX_CHUNKS)                      # ceil
    chunk = max(_MIN_CHUNK, ((chunk + _LANE - 1) // _LANE) * _LANE)
    return min(chunk, s_len)


def _pick_tile_n(n, s_len, itemsize, sublane, target_block_bytes):
    """Largest sublane-multiple row tile hitting ~target_block_bytes/input."""
    bytes_per_row = max(itemsize * s_len, 1)
    rows = target_block_bytes // bytes_per_row
    rows = max(sublane, (rows // sublane) * sublane)      # no artificial row cap
    padded_n = ((n + sublane - 1) // sublane) * sublane
    return int(min(rows, padded_n))


def _row_sums(x_ref, s_ref, make_terms, num_terms, s_len, chunk):
    """Per-row (lane-axis) sums of make_terms(x_chunk, s_chunk) over chunks.

    make_terms maps two (tile_n, c) f32 chunks to `num_terms` (tile_n, c)
    arrays; their lane sums are accumulated into (tile_n, 1) f32 columns.
    Temporaries only ever exist at chunk granularity — x_zm / s_zm style
    full-block arrays are never materialized or written back to VMEM.
    """
    tile_n = x_ref.shape[0]
    acc = [jnp.zeros((tile_n, 1), jnp.float32) for _ in range(num_terms)]
    for start in range(0, s_len, chunk):                  # <= _MAX_CHUNKS+1 static iters
        size = min(chunk, s_len - start)
        xc = x_ref[:, pl.ds(start, size)].astype(jnp.float32)
        sc = s_ref[:, pl.ds(start, size)].astype(jnp.float32)
        terms = make_terms(xc, sc)
        acc = [a + jnp.sum(t, axis=-1, keepdims=True) for a, t in zip(acc, terms)]
    return acc


def _sisnr_loss_kernel(x_ref, s_ref, out_ref, *, n_total, chunk):
    """Partial sum of per-row SI-SNR over one (tile_n, S) block of rows."""
    tile_n, s_len = x_ref.shape
    i = pl.program_id(0)
    inv_s = jnp.float32(1.0 / s_len)

    # Pass 1: per-row means (two-pass zero-mean keeps DC-offset accuracy).
    sum_x, sum_s = _row_sums(x_ref, s_ref, lambda xc, sc: (xc, sc), 2, s_len, chunk)
    mx = sum_x * inv_s
    ms = sum_s * inv_s

    # Pass 2: centered cross / auto moments, fused per chunk.
    def centered_moments(xc, sc):
        xz = xc - mx
        sz = sc - ms
        return xz * sz, sz * sz

    dot, s_energy = _row_sums(x_ref, s_ref, centered_moments, 2, s_len, chunk)

    alpha = dot / (s_energy + EPS)                      # (TN, 1)
    # ||t|| = |alpha| * ||s_zm||  (exact given s_energy; no cancellation).
    t_norm = jnp.abs(alpha) * jnp.sqrt(s_energy)

    # Pass 3: explicit residual ||x_zm - alpha*s_zm||^2 — matches the
    # reference and avoids the catastrophic cancellation of the rearranged
    # ||x||^2 - 2*alpha*dot + alpha^2*||s||^2 formula for high-SNR pairs.
    def residual(xc, sc):
        e = (xc - mx) - alpha * (sc - ms)
        return (e * e,)

    (e_sq,) = _row_sums(x_ref, s_ref, residual, 1, s_len, chunk)
    e_norm = jnp.sqrt(e_sq)

    sisnr = 20.0 * jnp.log10(EPS + t_norm / (e_norm + EPS))   # (TN, 1)

    # Mask padded rows of the (possibly partial) last tile.
    row = i * tile_n + jax.lax.broadcasted_iota(jnp.int32, (tile_n, 1), 0)
    sisnr = jnp.where(row < n_total, sisnr, 0.0)

    partial = jnp.sum(sisnr, axis=0, keepdims=True)            # (1, 1)
    # One fully tiled (8, 128) output block per grid step: unmasked vst, no
    # resident accumulator, so the grid axis stays "parallel".
    out_ref[...] = jnp.broadcast_to(partial.reshape(1, 1, 1), out_ref.shape)


def sisnr_loss(x, y, *, tile_n=None, core_parallel=False):
    """Negative mean SI-SNR, matching SISNRLoss.forward(x, y)."""
    if x.shape != y.shape:
        raise RuntimeError(
            "Dimention mismatch when calculate si-snr, {} vs {}".format(
                x.shape, y.shape
            )
        )
    n, s_len = x.shape

    x_item = jnp.dtype(x.dtype).itemsize
    y_item = jnp.dtype(y.dtype).itemsize
    sublane = max(_sublane_multiple(x.dtype), _sublane_multiple(y.dtype))

    vmem_cap = _vmem_capacity_bytes()
    # ~4 MiB/input blocks on 64 MiB-VMEM parts (v7x), ~8 MiB on 128 MiB parts.
    target_block_bytes = max(1 << 20, min(8 << 20, vmem_cap // 16))
    if tile_n is None:
        tile_n = _pick_tile_n(n, s_len, max(x_item, y_item), sublane,
                              target_block_bytes)
    num_tiles = int(pl.cdiv(n, tile_n))
    chunk = _pick_chunk(s_len)

    # VMEM budget from actual sizes: 2 inputs x 2 pipeline buffers + a handful
    # of chunk-sized f32 temporaries + margin (outputs are tiny).
    in_block_bytes = tile_n * s_len * (x_item + y_item)
    temp_bytes = 6 * tile_n * min(chunk, s_len) * 4
    need = 2 * in_block_bytes + temp_bytes + (1 << 20)
    if need > int(0.85 * vmem_cap):
        # TODO(synk): add an S-tiled (2D grid, "arbitrary" S axis) streaming
        # variant for very long signals where even a minimum-height row block
        # does not fit VMEM (e.g. S >~ 1M samples on v7x).
        raise NotImplementedError(
            "sisnr_loss: ({}, {}) block needs ~{} MiB VMEM (> {} MiB budget); "
            "S-tiled variant not implemented".format(
                tile_n, s_len, need >> 20, vmem_cap >> 20))
    vmem_limit = int(min(max(need, 16 << 20), int(0.85 * vmem_cap)))

    kernel = functools.partial(_sisnr_loss_kernel, n_total=n, chunk=chunk)

    # Advisory cost hint: HBM-bandwidth bound, 3 fused passes over each block.
    cost = pl.CostEstimate(
        flops=int(16 * n * s_len),
        transcendentals=int(3 * n),
        bytes_accessed=int(x.size * x_item + y.size * y_item
                           + num_tiles * 8 * 128 * 4),
    )

    # Per-tile outputs are independent -> "parallel" lets v7x shard tiles
    # across its two TensorCores.  CORE_PARALLEL is opt-in (verify on HW).
    semantics = (pltpu.CORE_PARALLEL,) if core_parallel else ("parallel",)

    partials = pl.pallas_call(
        kernel,
        out_shape=jax.ShapeDtypeStruct((num_tiles, 8, 128), jnp.float32),
        grid_spec=pltpu.PrefetchScalarGridSpec(
            num_scalar_prefetch=0,
            grid=(num_tiles,),
            in_specs=[
                pl.BlockSpec((tile_n, s_len), lambda i: (i, 0)),
                pl.BlockSpec((tile_n, s_len), lambda i: (i, 0)),
            ],
            out_specs=pl.BlockSpec((1, 8, 128), lambda i: (i, 0, 0)),
        ),
        compiler_params=pltpu.CompilerParams(
            dimension_semantics=semantics,
            vmem_limit_bytes=vmem_limit,
        ),
        cost_estimate=cost,
    )(x, y)

    # Final reduction over per-tile partial sums in the wrapper.
    return -(jnp.sum(partials[:, 0, 0]) / jnp.float32(n))


def _sisnr_loss_ref(x, s, eps=EPS):
    x = x.astype(jnp.float32)
    s = s.astype(jnp.float32)
    x_zm = x - jnp.mean(x, axis=-1, keepdims=True)
    s_zm = s - jnp.mean(s, axis=-1, keepdims=True)
    t = (
        jnp.sum(x_zm * s_zm, axis=-1, keepdims=True)
        * s_zm
        / (jnp.linalg.norm(s_zm, axis=-1, keepdims=True) ** 2 + eps)
    )
    sisnr = 20.0 * jnp.log10(
        eps
        + jnp.linalg.norm(t, axis=-1)
        / (jnp.linalg.norm(x_zm - t, axis=-1) + eps)
    )
    return -jnp.mean(sisnr)


if __name__ == "__main__":
    key = jax.random.PRNGKey(0)
    keys = jax.random.split(key, 10)

    # 1) Small, divisible batch (single chunk, single tile).
    x1 = jax.random.normal(keys[0], (8, 128), jnp.float32)
    y1 = x1 + 0.3 * jax.random.normal(keys[1], (8, 128), jnp.float32)
    l1 = sisnr_loss(x1, y1)
    r1 = _sisnr_loss_ref(x1, y1)
    assert jnp.allclose(l1, r1, rtol=1e-4, atol=1e-5), (l1, r1)

    # 2) Batch not a multiple of the row tile + multi-tile grid (tail masking).
    x2 = jax.random.normal(keys[2], (10, 256), jnp.float32)
    y2 = x2 + 0.5 * jax.random.normal(keys[3], (10, 256), jnp.float32)
    l2 = sisnr_loss(x2, y2, tile_n=8)
    r2 = _sisnr_loss_ref(x2, y2)
    assert jnp.allclose(l2, r2, rtol=1e-4, atol=1e-5), (l2, r2)

    # 3) Multi-chunk time axis (3 full 512-lane chunks + 128-lane tail).
    x3 = jax.random.normal(keys[4], (24, 1664), jnp.float32)
    y3 = 0.8 * x3 + 0.2 * jax.random.normal(keys[5], (24, 1664), jnp.float32)
    l3 = sisnr_loss(x3, y3)
    r3 = _sisnr_loss_ref(x3, y3)
    assert jnp.allclose(l3, r3, rtol=1e-4, atol=1e-5), (l3, r3)

    # 4) High-SNR pair with a DC offset: exercises the explicit-residual path
    #    that fixes the catastrophic-cancellation concern.
    x4 = jax.random.normal(keys[6], (8, 512), jnp.float32) + 3.0
    y4 = x4 + 1e-4 * jax.random.normal(keys[7], (8, 512), jnp.float32)
    l4 = sisnr_loss(x4, y4)
    r4 = _sisnr_loss_ref(x4, y4)
    assert jnp.allclose(l4, r4, rtol=1e-3, atol=5e-2), (l4, r4)

    # 5) bf16 inputs (16-row sublane packing + masked padded rows).
    x5 = jax.random.normal(keys[8], (12, 384), jnp.float32).astype(jnp.bfloat16)
    y5 = (x5.astype(jnp.float32)
          + 0.3 * jax.random.normal(keys[9], (12, 384), jnp.float32)
          ).astype(jnp.bfloat16)
    l5 = sisnr_loss(x5, y5)
    r5 = _sisnr_loss_ref(x5, y5)
    assert jnp.allclose(l5, r5, rtol=1e-4, atol=1e-4), (l5, r5)

    jax.block_until_ready((l1, l2, l3, l4, l5))
    print("KERNEL_OK")
</pallas_src>

<mosaic_0001>
module attributes {stable_mosaic.version = 11 : i64} {
  func.func @_sisnr_loss_kernel(%arg0: i32, %arg1: memref<8x128xf32, #tpu.memory_space<vmem>>, %arg2: memref<8x128xf32, #tpu.memory_space<vmem>>, %arg3: memref<1x8x128xf32, #tpu.memory_space<vmem>>) attributes {dimension_semantics = [#tpu.dimension_semantics<parallel>], iteration_bounds = array<i64: 1>, scalar_prefetch = 0 : i64, scratch_operands = 0 : i64, tpu.core_type = #tpu.core_type<tc>, window_params = [{transform_indices = @transform_0, window_bounds = array<i64: 8, 128>}, {transform_indices = @transform_1, window_bounds = array<i64: 8, 128>}, {transform_indices = @transform_2, window_bounds = array<i64: 1, 8, 128>}]} {
    %cst = arith.constant 0.000000e+00 : f32
    %0 = vector.broadcast %cst : f32 to vector<8x1xf32>
    %cst_0 = arith.constant 0.000000e+00 : f32
    %1 = vector.broadcast %cst_0 : f32 to vector<8x1xf32>
    %c0 = arith.constant 0 : index
    %c0_1 = arith.constant 0 : index
    %2 = vector.load %arg1[%c0, %c0_1] : memref<8x128xf32, #tpu.memory_space<vmem>>, vector<8x128xf32>
    %c0_2 = arith.constant 0 : index
    %c0_3 = arith.constant 0 : index
    %3 = vector.load %arg2[%c0_2, %c0_3] : memref<8x128xf32, #tpu.memory_space<vmem>>, vector<8x128xf32>
    %cst_4 = arith.constant dense<0.000000e+00> : vector<8xf32>
    %4 = vector.multi_reduction <add>, %2, %cst_4 [1] : vector<8x128xf32> to vector<8xf32>
    %5 = vector.shape_cast %4 : vector<8xf32> to vector<8x1xf32>
    %6 = arith.addf %0, %5 : vector<8x1xf32>
    %cst_5 = arith.constant dense<0.000000e+00> : vector<8xf32>
    %7 = vector.multi_reduction <add>, %3, %cst_5 [1] : vector<8x128xf32> to vector<8xf32>
    %8 = vector.shape_cast %7 : vector<8xf32> to vector<8x1xf32>
    %9 = arith.addf %1, %8 : vector<8x1xf32>
    %cst_6 = arith.constant 7.812500e-03 : f32
    %10 = vector.broadcast %cst_6 : f32 to vector<8x1xf32>
    %11 = arith.mulf %6, %10 : vector<8x1xf32>
    %cst_7 = arith.constant 7.812500e-03 : f32
    %12 = vector.broadcast %cst_7 : f32 to vector<8x1xf32>
    %13 = arith.mulf %9, %12 : vector<8x1xf32>
    %cst_8 = arith.constant 0.000000e+00 : f32
    %14 = vector.broadcast %cst_8 : f32 to vector<8x1xf32>
    %cst_9 = arith.constant 0.000000e+00 : f32
    %15 = vector.broadcast %cst_9 : f32 to vector<8x1xf32>
    %c0_10 = arith.constant 0 : index
    %c0_11 = arith.constant 0 : index
    %16 = vector.load %arg1[%c0_10, %c0_11] : memref<8x128xf32, #tpu.memory_space<vmem>>, vector<8x128xf32>
    %c0_12 = arith.constant 0 : index
    %c0_13 = arith.constant 0 : index
    %17 = vector.load %arg2[%c0_12, %c0_13] : memref<8x128xf32, #tpu.memory_space<vmem>>, vector<8x128xf32>
    %18 = vector.broadcast %11 : vector<8x1xf32> to vector<8x128xf32>
    %19 = arith.subf %16, %18 : vector<8x128xf32>
    %20 = vector.broadcast %13 : vector<8x1xf32> to vector<8x128xf32>
    %21 = arith.subf %17, %20 : vector<8x128xf32>
    %22 = arith.mulf %19, %21 : vector<8x128xf32>
    %23 = arith.mulf %21, %21 : vector<8x128xf32>
    %cst_14 = arith.constant dense<0.000000e+00> : vector<8xf32>
    %24 = vector.multi_reduction <add>, %22, %cst_14 [1] : vector<8x128xf32> to vector<8xf32>
    %25 = vector.shape_cast %24 : vector<8xf32> to vector<8x1xf32>
    %26 = arith.addf %14, %25 : vector<8x1xf32>
    %cst_15 = arith.constant dense<0.000000e+00> : vector<8xf32>
    %27 = vector.multi_reduction <add>, %23, %cst_15 [1] : vector<8x128xf32> to vector<8xf32>
    %28 = vector.shape_cast %27 : vector<8xf32> to vector<8x1xf32>
    %29 = arith.addf %15, %28 : vector<8x1xf32>
    %cst_16 = arith.constant 9.99999993E-9 : f32
    %30 = vector.broadcast %cst_16 : f32 to vector<8x1xf32>
    %31 = arith.addf %29, %30 : vector<8x1xf32>
    %32 = arith.divf %26, %31 : vector<8x1xf32>
    %33 = math.absf %32 : vector<8x1xf32>
    %34 = math.sqrt %29 : vector<8x1xf32>
    %35 = arith.mulf %33, %34 : vector<8x1xf32>
    %cst_17 = arith.constant 0.000000e+00 : f32
    %36 = vector.broadcast %cst_17 : f32 to vector<8x1xf32>
    %c0_18 = arith.constant 0 : index
    %c0_19 = arith.constant 0 : index
    %37 = vector.load %arg1[%c0_18, %c0_19] : memref<8x128xf32, #tpu.memory_space<vmem>>, vector<8x128xf32>
    %c0_20 = arith.constant 0 : index
    %c0_21 = arith.constant 0 : index
    %38 = vector.load %arg2[%c0_20, %c0_21] : memref<8x128xf32, #tpu.memory_space<vmem>>, vector<8x128xf32>
    %39 = vector.broadcast %11 : vector<8x1xf32> to vector<8x128xf32>
    %40 = arith.subf %37, %39 : vector<8x128xf32>
    %41 = vector.broadcast %13 : vector<8x1xf32> to vector<8x128xf32>
    %42 = arith.subf %38, %41 : vector<8x128xf32>
    %43 = vector.broadcast %32 : vector<8x1xf32> to vector<8x128xf32>
    %44 = arith.mulf %43, %42 : vector<8x128xf32>
    %45 = arith.subf %40, %44 : vector<8x128xf32>
    %46 = arith.mulf %45, %45 : vector<8x128xf32>
    %cst_22 = arith.constant dense<0.000000e+00> : vector<8xf32>
    %47 = vector.multi_reduction <add>, %46, %cst_22 [1] : vector<8x128xf32> to vector<8xf32>
    %48 = vector.shape_cast %47 : vector<8xf32> to vector<8x1xf32>
    %49 = arith.addf %36, %48 : vector<8x1xf32>
    %50 = math.sqrt %49 : vector<8x1xf32>
    %cst_23 = arith.constant 9.99999993E-9 : f32
    %51 = vector.broadcast %cst_23 : f32 to vector<8x1xf32>
    %52 = arith.addf %50, %51 : vector<8x1xf32>
    %53 = arith.divf %35, %52 : vector<8x1xf32>
    %cst_24 = arith.constant 9.99999993E-9 : f32
    %54 = vector.broadcast %cst_24 : f32 to vector<8x1xf32>
    %55 = arith.addf %54, %53 : vector<8x1xf32>
    %56 = math.log %55 : vector<8x1xf32>
    %cst_25 = arith.constant 0.434294492 : f32
    %57 = vector.broadcast %cst_25 : f32 to vector<8x1xf32>
    %58 = arith.mulf %56, %57 : vector<8x1xf32>
    %cst_26 = arith.constant 2.000000e+01 : f32
    %59 = vector.broadcast %cst_26 : f32 to vector<8x1xf32>
    %60 = arith.mulf %59, %58 : vector<8x1xf32>
    %c8_i32 = arith.constant 8 : i32
    %61 = arith.muli %arg0, %c8_i32 : i32
    %62 = tpu.iota {dimensions = array<i32: 0>} : vector<8x1xi32>
    %63 = vector.broadcast %61 : i32 to vector<8x1xi32>
    %64 = arith.addi %63, %62 : vector<8x1xi32>
    %c8_i32_27 = arith.constant 8 : i32
    %65 = vector.broadcast %c8_i32_27 : i32 to vector<8x1xi32>
    %66 = arith.cmpi slt, %64, %65 : vector<8x1xi32>
    %cst_28 = arith.constant 0.000000e+00 : f32
    %67 = vector.broadcast %cst_28 : f32 to vector<8x1xf32>
    %68 = arith.select %66, %60, %67 : vector<8x1xi1>, vector<8x1xf32>
    %cst_29 = arith.constant dense<0.000000e+00> : vector<1xf32>
    %69 = vector.multi_reduction <add>, %68, %cst_29 [0] : vector<8x1xf32> to vector<1xf32>
    %70 = vector.shape_cast %69 : vector<1xf32> to vector<1x1xf32>
    %71 = vector.shape_cast %70 : vector<1x1xf32> to vector<1x1x1xf32>
    %72 = vector.shape_cast %71 : vector<1x1x1xf32> to vector<1x1x1xf32>
    %73 = vector.broadcast %72 : vector<1x1x1xf32> to vector<1x8x128xf32>
    %c0_30 = arith.constant 0 : index
    %c0_31 = arith.constant 0 : index
    %c0_32 = arith.constant 0 : index
    %74 = vector.load %arg3[%c0_30, %c0_31, %c0_32] : memref<1x8x128xf32, #tpu.memory_space<vmem>>, vector<1x8x128xf32>
    tpu.vector_store %arg3[%c0_30, %c0_31, %c0_32], %73 {strides = array<i32>} : memref<1x8x128xf32, #tpu.memory_space<vmem>>, vector<1x8x128xf32>,
    return
  }
  func.func @transform_0(%arg0: i32) -> (i32, i32) {
    %c0_i32 = arith.constant 0 : i32
    %c0_i32_0 = arith.constant 0 : i32
    return %arg0, %c0_i32 : i32, i32
  }
  func.func @transform_1(%arg0: i32) -> (i32, i32) {
    %c0_i32 = arith.constant 0 : i32
    %c0_i32_0 = arith.constant 0 : i32
    return %arg0, %c0_i32 : i32, i32
  }
  func.func @transform_2(%arg0: i32) -> (i32, i32, i32) {
    %c0_i32 = arith.constant 0 : i32
    %c0_i32_0 = arith.constant 0 : i32
    %c0_i32_1 = arith.constant 0 : i32
    return %arg0, %c0_i32, %c0_i32_0 : i32, i32, i32
  }
}

</mosaic_0001>

<bundles_post_ra>
// kernel: tpu_custom_call.1
= control target key start
LH: loop header
LB: loop body
LE: loop exit
PB: predicated region body
PF: predicated region fallthrough
CT: control target
= control target key end

     0   :  { %7 = vsyncpa [#allocation3], 0  ;;  %s258_s0 = inlined_call_operand.hbm [shape: f32[8,128], index: 0, kind: input, shape index: {}]   ;;  %s259_s1 = inlined_call_operand.hbm [shape: f32[8,128], index: 1, kind: input, shape index: {}]   ;;  %s260_s2 = inlined_call_operand.hbm [shape: f32[1,8,128], index: 2, kind: output, shape index: {}]  }
   0x1   :  { %8 = vsyncpa [#allocation6], 0 }
   0x2   :  { %9 = vsyncpa [#allocation4], 0  ;;  %s204_s9 = smov [#allocation2]   ;;  %s205_s11 = smov [#allocation5]  }
   0x3   :  { %s16_s10 = sshll.u32 %s204_s9, 4  ;;  %s26_s12 = sshll.u32 %s205_s11, 4  ;;  %s17_s10 = int_to_ptr.vmem [resolvable:$true] %s16_s10  ;;  %s27_s12 = int_to_ptr.vmem [resolvable:$true] %s26_s12 }
   0x4   :  { %s132_s15 = scalar_lea.hbm %s258_s0, 128 }
   0x5   :  { %p133_p0 = scmp.ne.s32.totalorder %s258_s0, %s132_s15  ;;  %p136_p1 = scmp.lt.u32.totalorder %s132_s15, %s258_s0 }
   0x7   :  { %p138_p2 = pnand %p136_p1, %p133_p0 }
   0x9   :  { %141 = shalt.err (!%p138_p2)
}
   0xa   :  { %s142_s20 = scalar_lea.vmem %s17_s10, 128  ;;  %p147_p4 = scmp.lt.s32.totalorder %s17_s10, %s17_s10 }
   0xb   :  { %p143_p3 = scmp.ne.s32.totalorder %s17_s10, %s142_s20  ;;  %p148_p5 = scmp.lt.s32.totalorder %s142_s20, %s142_s20 }
   0xd   :  { %p149_p6 = por %p148_p5, %p147_p4 }
   0xf   :  { %p150_p7 = pnand %p149_p6, %p143_p3 }
  0x11   :  { %153 = shalt.err (!%p150_p7)
}
  0x12   :  { %19 = dma.hbm_to_vmem [thread:$0]  %s258_s0, 128, %s17_s10, [#allocation3]  }
  0x13   :  { %s154_s25 = scalar_lea.hbm %s259_s1, 128 }
  0x14   :  { %p155_p8 = scmp.ne.s32.totalorder %s259_s1, %s154_s25  ;;  %p158_p9 = scmp.lt.u32.totalorder %s154_s25, %s259_s1 }
  0x16   :  { %p160_p10 = pnand %p158_p9, %p155_p8 }
  0x18   :  { %163 = shalt.err (!%p160_p10)
}
  0x19   :  { %s164_s30 = scalar_lea.vmem %s27_s12, 128  ;;  %p169_p12 = scmp.lt.s32.totalorder %s27_s12, %s27_s12 }
  0x1a   :  { %p165_p11 = scmp.ne.s32.totalorder %s27_s12, %s164_s30  ;;  %p170_p13 = scmp.lt.s32.totalorder %s164_s30, %s164_s30 }
  0x1c   :  { %p171_p0 = por %p170_p13, %p169_p12 }
  0x1e   :  { %p172_p1 = pnand %p171_p0, %p165_p11 }
  0x20   :  { %175 = shalt.err (!%p172_p1)
}
  0x21   :  { %29 = dma.hbm_to_vmem [thread:$0]  %s259_s1, 128, %s27_s12, [#allocation6]  }
  0x22   :  { %198 = dma.done.wait [#allocation3], 128  }
  0x23   :  { %199 = vsyncadd [#allocation3], 4294967168 }
  0x24   :  { %200 = dma.done.wait [#allocation6], 128  }
  0x25   :  { %201 = vsyncadd [#allocation6], 4294967168  ;;  %v37_v0 = vld [vmem:[#allocation5] sm:$0xff]  ;;  %v36_v1 = vld [vmem:[#allocation2] sm:$0xff]  ;;  %s206_s1 = smov [#allocation7]  }
  0x26   :  { %41 = vadd.xlane.f32.xlu0 %v37_v0  ;;  %s109_s4 = sshll.u32 %s206_s1, 4  ;;  %s110_s4 = int_to_ptr.vmem [resolvable:$true] %s109_s4 }
  0x27   :  { %s176_s5 = scalar_lea.vmem %s110_s4, 128  ;;  %p181_p3 = scmp.lt.s32.totalorder %s110_s4, %s110_s4 }
  0x28   :  { %p177_p2 = scmp.ne.s32.totalorder %s110_s4, %s176_s5  ;;  %p182_p4 = scmp.lt.s32.totalorder %s176_s5, %s176_s5 }
  0x2a   :  { %38 = vadd.xlane.f32.xlu0 %v36_v1  ;;  %p183_p5 = por %p182_p4, %p181_p3 }
  0x2c   :  { %p184_p6 = pnand %p183_p5, %p177_p2 }
  0xb3   :  { %v42_v2 = vpop.xlane.xlu0 %41 }
  0xb4   :  { %v45_v3 = vmul.f32 0.0078125, %v42_v2 }
  0xb6   :  { %v47_v4 = vsub.f32 %v37_v0, %v45_v3 }
  0xb7   :  { %v39_v5 = vpop.xlane.xlu0 %38 }
  0xb8   :  { %v44_v6 = vmul.f32 0.0078125, %v39_v5  ;;  %v49_v7 = vmul.f32 %v47_v4, %v47_v4 }
  0xba   :  { %v46_v8 = vsub.f32 %v36_v1, %v44_v6  ;;  %53 = vadd.xlane.f32.xlu1 %v49_v7 }
  0xbc   :  { %v48_v9 = vmul.f32 %v47_v4, %v46_v8 }
  0xbe   :  { %50 = vadd.xlane.f32.xlu1 %v48_v9 }
 0x147   :  { %v54_v10 = vpop.xlane.xlu1 %53 }
 0x148   :  { %122 = vrsqrt.f32 %v54_v10  ;;  %v56_v11 = vadd.f32 1e-08, %v54_v10  ;;  %vm62_vm0 = vcmp.eq.f32.partialorder %v54_v10, inf  ;;  %v65_v18 = vand.u32 2147483648, %v54_v10 }
 0x149   :  { %vm64_vm1 = vcmp.eq.f32.partialorder %v54_v10, 0.0 }
 0x14a   :  { %124 = vrcp.f32 %v56_v11 }
 0x14b   :  { %v51_v15 = vpop.xlane.xlu1 %50 }
 0x152   :  { %v123_v12 = vpop.eup %122 }
 0x153   :  { %v61_v13 = vmul.f32 %v123_v12, %v54_v10 }
 0x154   :  { %v125_v14 = vpop.eup %124 }
 0x155   :  { %v63_v16 = vsel %vm62_vm0, %v54_v10, %v61_v13  ;;  %v58_v17 = vmul.f32 %v125_v14, %v51_v15 }
 0x156   :  { %v66_v21 = vsel %vm64_vm1, %v65_v18, %v63_v16 }
 0x157   :  { %v59_v19 = vand.u32 2147483647, %v58_v17  ;;  %v68_v20 = vmul.f32 %v58_v17, %v47_v4 }
 0x159   :  { %v67_v22 = vmul.f32 %v66_v21, %v59_v19  ;;  %v69_v23 = vsub.f32 %v46_v8, %v68_v20 }
 0x15b   :  { %v70_v24 = vmul.f32 %v69_v23, %v69_v23 }
 0x15d   :  { %71 = vadd.xlane.f32.xlu0 %v70_v24 }
 0x1ea   :  { %v72_v25 = vpop.xlane.xlu0 %71 }
 0x1eb   :  { %126 = vrsqrt.f32 %v72_v25  ;;  %vm76_vm2 = vcmp.eq.f32.partialorder %v72_v25, inf  ;;  %v79_v28 = vand.u32 2147483648, %v72_v25  ;;  %vm78_vm3 = vcmp.eq.f32.partialorder %v72_v25, 0.0 }
 0x1f5   :  { %v127_v26 = vpop.eup %126 }
 0x1f6   :  { %v75_v27 = vmul.f32 %v127_v26, %v72_v25 }
 0x1f8   :  { %v77_v29 = vsel %vm76_vm2, %v72_v25, %v75_v27 }
 0x1f9   :  { %v80_v30 = vsel %vm78_vm3, %v79_v28, %v77_v29 }
 0x1fa   :  { %v81_v31 = vadd.f32 1e-08, %v80_v30 }
 0x1fc   :  { %128 = vrcp.f32 %v81_v31 }
 0x206   :  { %v129_v32 = vpop.eup %128 }
 0x207   :  { %v83_v33 = vmul.f32 %v129_v32, %v67_v22 }
 0x209   :  { %v84_v34 = vadd.f32 1e-08, %v83_v33 }
 0x20b   :  { %130 = vlog2.f32 %v84_v34 }
 0x215   :  { %v131_v35 = vpop.eup %130 }
 0x216   :  { %v86_v36 = vmul.f32 0.6931472, %v131_v35 }
 0x218   :  { %v87_v37 = vmul.f32 0.4342945, %v86_v36 }
 0x21a   :  { %v88_v38 = vmul.f32 20.0, %v87_v37 }
 0x21c   :  { %v96_v39 = vrot.slane %v88_v38, 4 }
 0x21e   :  { %v97_v40 = vadd.f32 %v96_v39, %v88_v38 }
 0x220   :  { %v98_v41 = vrot.slane %v97_v40, 2 }
 0x222   :  { %v99_v42 = vadd.f32 %v98_v41, %v97_v40 }
 0x224   :  { %v100_v43 = vrot.slane %v99_v42, 1 }
 0x226   :  { %v101_v44 = vadd.f32 %v100_v43, %v99_v42 }
 0x228   :  { %102 = vst [vmem:[#allocation7] sm:$0xff] %v101_v44 }
 0x229   :  { %187 = shalt.err (!%p184_p6)
}
 0x22a   :  { %s188_s8 = scalar_lea.hbm %s260_s2, 128 }
 0x22b   :  { %p189_p7 = scmp.ne.s32.totalorder %s260_s2, %s188_s8  ;;  %p192_p8 = scmp.lt.u32.totalorder %s188_s8, %s260_s2 }
 0x22d   :  { %p194_p9 = pnand %p192_p8, %p189_p7 }
 0x22f   :  { %197 = shalt.err (!%p194_p9)
}
 0x230   :  { %112 = dma.vmem_to_hbm [thread:$0]  %s110_s4, 128, %s260_s2, [#allocation4]  }
 0x231   :  { %202 = dma.done.wait [#allocation4], 128  }
 0x232   :  { %203 = vsyncadd [#allocation4], 4294967168 }
 0x233   :  { %116 = vsyncpa [#allocation3], 1 }
 0x234   :  { %117 = vsyncpa [#allocation6], 1 }
 0x235   :  { %118 = vsyncpa [#allocation4], 1 }

</bundles_post_ra>
